<compile_context>
chip_gen: v5e
topology: v5e:2x2
jax: 0.10.0
libtpu: 0.0.40
codegen_flags: <defaults>
</compile_context>

<pallas_src>
import jax
import jax.numpy as jnp
from jax.experimental import pallas as pl
from jax.experimental.pallas import tpu as pltpu

SEQ = 8        # `seq` global used by the PyTorch module
HID = 16       # hidden_size
BATCH = 2

# Packed-parameter buffer layout (P_ROWS x 128 lanes, f32):
#   rows [0, H)           lanes [0, 4H) : W_hh^T   (H, 4H)   (g cols pre-scaled x2)
#   row  H                lanes [0, 4H) : W_ih^T   (1, 4H)   (g cols pre-scaled x2)
#   row  H + 1            lanes [0, 4H) : b_ih+b_hh (1, 4H)  (g cols pre-scaled x2)
#   row  H + 2            lanes [0, 4H) : gate "mul" mask (2 on g lanes, 1 else)
#   row  H + 3            lanes [0, 4H) : gate "add" mask (-1 on g lanes, 0 else)
#   row  H + 4            lane  0       : b_lin
#   rows [W_LIN_ROW, +S)  lanes [0, H)  : W_lin.reshape(S, H) (row t multiplies h_t)
W_LIN_ROW = ((HID + 5 + 7) // 8) * 8           # 24 (sublane aligned)
P_ROWS = ((W_LIN_ROW + SEQ + 7) // 8) * 8      # 32
P_LANES = 128


def lstm_kernel(x_ref, p_ref, out_ref):
    """Single-program kernel: the whole problem fits in VMEM.

    x_ref   : (S*B, 1)          float32   time-major flattened input (row t*B + b)
    p_ref   : (P_ROWS, 128)     float32   packed parameters (layout above)
    out_ref : (B, 1)            float32
    """
    S, H = SEQ, HID
    G = 4 * H
    B = x_ref.shape[0] // S

    x = x_ref[...]                                 # (S*B, 1)
    p = p_ref[...]                                 # (P_ROWS, 128) single load

    w_hh = p[0:H, 0:G]                             # (H, 4H)   g cols pre-scaled x2
    w_ih = p[H:H + 1, 0:G]                         # (1, 4H)   g cols pre-scaled x2
    b = p[H + 1:H + 2, 0:G]                        # (1, 4H)   g cols pre-scaled x2
    mul = jnp.broadcast_to(p[H + 2:H + 3, 0:G], (B, G))   # hoisted, loop-invariant
    add = jnp.broadcast_to(p[H + 3:H + 4, 0:G], (B, G))   # hoisted, loop-invariant
    b_lin = p[H + 4:H + 5, 0:1]                    # (1, 1)
    w_lin = p[W_LIN_ROW:W_LIN_ROW + S, 0:H]        # (S, H)

    # Loop-invariant precomputation (no dependence on h/c, scheduled off the
    # serial recurrence chain): all S input->gate contributions in ONE
    # broadcast FMA over a (S*B, 4H) tile.
    gx_all = x * w_ih + b                                          # (S*B, 4H)
    gates_x = [gx_all[t * B:(t + 1) * B, :] for t in range(S)]     # S x (B, 4H)
    w_lin_rows = [jnp.broadcast_to(w_lin[t:t + 1, :], (B, H))      # S x (B, H)
                  for t in range(S)]

    h = jnp.zeros((B, H), jnp.float32)
    c = jnp.zeros((B, H), jnp.float32)
    acc = jnp.zeros((B, H), jnp.float32)           # lane-parallel Linear accumulator

    # Static unroll over the (small) sequence.  PyTorch gate order: i, f, g, o.
    for t in range(S):
        # Explicit precision decision: DEFAULT (single MXU pass).  The pure-JAX
        # reference uses the same precision, and adding HIGHEST would put 2-5
        # extra vmatmul passes per step on the serial chain.
        gates = gates_x[t] + jnp.dot(
            h, w_hh,
            preferred_element_type=jnp.float32,
            precision=jax.lax.Precision.DEFAULT)
        # Single EUP pass for all four gates: g lanes hold 2x the pre-activation
        # (weights pre-scaled), so tanh(x) = 2*sigmoid(2x) - 1 is recovered with
        # one VPU FMA using the packed mul/add masks.
        act = jax.nn.sigmoid(gates)                # one EUP pass over (B, 4H)
        act = act * mul + add                      # [sig(i)|sig(f)|tanh(g)|sig(o)]
        i_g = act[:, 0 * H:1 * H]
        f_g = act[:, 1 * H:2 * H]
        g_g = act[:, 2 * H:3 * H]
        o_g = act[:, 3 * H:4 * H]
        c = f_g * c + i_g * g_g
        h = o_g * jnp.tanh(c)                      # tanh(c) is inherently on-chain
        acc = acc + h * w_lin_rows[t]              # VPU FMA; no per-step reduction

    # Single cross-lane reduction + bias for the Linear(16*seq -> 1).
    out_ref[...] = jnp.sum(acc, axis=-1, keepdims=True) + b_lin


def pack_params(w_ih, w_hh, b_ih, b_hh, w_lin, b_lin):
    """Build the packed (P_ROWS, 128) parameter buffer ONCE (weights are static).

    Single concatenate+pad chain (no dynamic-update-slice per call); g-gate
    columns pre-scaled by 2 so the kernel needs only one sigmoid per step.
    """
    H, S, G = HID, SEQ, 4 * HID
    g_scale = jnp.concatenate([
        jnp.ones((2 * H,), jnp.float32),
        jnp.full((H,), 2.0, jnp.float32),
        jnp.ones((H,), jnp.float32)])                              # (4H,)

    w_hh_t = jnp.transpose(jnp.asarray(w_hh, jnp.float32)) * g_scale        # (H, 4H)
    w_ih_t = jnp.transpose(jnp.asarray(w_ih, jnp.float32)).reshape(1, G) * g_scale
    b_row = (jnp.asarray(b_ih, jnp.float32)
             + jnp.asarray(b_hh, jnp.float32)).reshape(1, G) * g_scale
    mul_row = g_scale.reshape(1, G)                 # 2 on g lanes, 1 elsewhere
    add_row = (1.0 - g_scale).reshape(1, G)         # -1 on g lanes, 0 elsewhere
    blin_row = jnp.pad(jnp.asarray(b_lin, jnp.float32).reshape(1, 1),
                       ((0, 0), (0, G - 1)))        # (1, G), lane 0 = b_lin

    top = jnp.concatenate(
        [w_hh_t, w_ih_t, b_row, mul_row, add_row, blin_row], axis=0)        # (H+5, G)
    top = jnp.pad(top, ((0, W_LIN_ROW - (H + 5)), (0, P_LANES - G)))        # (24, 128)

    wl = jnp.asarray(w_lin, jnp.float32).reshape(S, H)                      # (S, H)
    wl = jnp.pad(wl, ((0, P_ROWS - W_LIN_ROW - S), (0, P_LANES - H)))       # (8, 128)

    return jnp.concatenate([top, wl], axis=0)                               # (32, 128)


@jax.jit
def lstm_forward(x, packed_params):
    """x: (B, S, 1) float32, packed_params: (P_ROWS, 128) -> (B, 1) float32."""
    B, S, I = x.shape
    assert I == 1 and S == SEQ
    # Layout plumbing only: time-major flatten so the kernel's gates_x
    # precompute is one broadcast FMA.
    x_tm = jnp.transpose(x.reshape(B, S)).reshape(S * B, 1).astype(jnp.float32)

    vmem = pl.BlockSpec(memory_space=pltpu.MemorySpace.VMEM)
    return pl.pallas_call(
        lstm_kernel,
        out_shape=jax.ShapeDtypeStruct((B, 1), jnp.float32),
        in_specs=[vmem, vmem],
        out_specs=vmem,
    )(x_tm, packed_params)


def _reference(x, w_ih, w_hh, b_ih, b_hh, w_lin, b_lin):
    """Pure-JAX reference matching the PyTorch module semantics."""
    B, S, _ = x.shape
    H = HID
    h = jnp.zeros((B, H), jnp.float32)
    c = jnp.zeros((B, H), jnp.float32)
    b = (b_ih + b_hh).reshape(1, 4 * H)
    outs = []
    for t in range(S):
        g = x[:, t, :] @ w_ih.T + h @ w_hh.T + b
        i_g = jax.nn.sigmoid(g[:, 0 * H:1 * H])
        f_g = jax.nn.sigmoid(g[:, 1 * H:2 * H])
        g_g = jnp.tanh(g[:, 2 * H:3 * H])
        o_g = jax.nn.sigmoid(g[:, 3 * H:4 * H])
        c = f_g * c + i_g * g_g
        h = o_g * jnp.tanh(c)
        outs.append(h)
    seq_out = jnp.stack(outs, axis=1).reshape(B, S * H)
    return seq_out @ w_lin.T + b_lin.reshape(1, 1)


if __name__ == "__main__":
    key = jax.random.PRNGKey(0)
    kx, k1, k2, k3, k4, k5, k6 = jax.random.split(key, 7)

    # Deterministic synthetic parameters (shapes match nn.LSTM / nn.Linear).
    scale = 1.0 / jnp.sqrt(HID)
    w_ih = jax.random.uniform(k1, (4 * HID, 1), minval=-scale, maxval=scale)
    w_hh = jax.random.uniform(k2, (4 * HID, HID), minval=-scale, maxval=scale)
    b_ih = jax.random.uniform(k3, (4 * HID,), minval=-scale, maxval=scale)
    b_hh = jax.random.uniform(k4, (4 * HID,), minval=-scale, maxval=scale)
    lin_scale = 1.0 / jnp.sqrt(HID * SEQ)
    w_lin = jax.random.uniform(k5, (1, HID * SEQ), minval=-lin_scale, maxval=lin_scale)
    b_lin = jax.random.uniform(k6, (1,), minval=-lin_scale, maxval=lin_scale)

    x = jax.random.normal(kx, (BATCH, SEQ, 1), dtype=jnp.float32)

    # Pack the parameters ONCE (hoisted out of the per-call hot path).
    params = pack_params(w_ih, w_hh, b_ih, b_hh, w_lin, b_lin)
    jax.block_until_ready(params)

    out = lstm_forward(x, params)
    jax.block_until_ready(out)
    assert out.shape == (BATCH, 1)

    ref = _reference(x, w_ih, w_hh, b_ih, b_hh, w_lin, b_lin)
    # Tolerance covers the tanh(x) = 2*sigmoid(2x) - 1 fusion and EUP-vs-XLA
    # transcendental implementation differences (observed error << 1e-4).
    assert jnp.allclose(out, ref, atol=1e-4, rtol=1e-4), (out, ref)

    print("KERNEL_OK")
</pallas_src>

<mosaic_0001>
module attributes {stable_mosaic.version = 11 : i64} {
  func.func @lstm_kernel(%arg0: memref<16x1xf32, #tpu.memory_space<vmem>>, %arg1: memref<32x128xf32, #tpu.memory_space<vmem>>, %arg2: memref<2x1xf32, #tpu.memory_space<vmem>>) attributes {dimension_semantics = [], scalar_prefetch = 0 : i64, scratch_operands = 0 : i64, tpu.core_type = #tpu.core_type<tc>} {
    %c0 = arith.constant 0 : index
    %c0_0 = arith.constant 0 : index
    %0 = vector.load %arg0[%c0, %c0_0] : memref<16x1xf32, #tpu.memory_space<vmem>>, vector<16x1xf32>
    %c0_1 = arith.constant 0 : index
    %c0_2 = arith.constant 0 : index
    %1 = vector.load %arg1[%c0_1, %c0_2] : memref<32x128xf32, #tpu.memory_space<vmem>>, vector<32x128xf32>
    %2 = vector.extract_strided_slice %1 {offsets = [0, 0], sizes = [16, 64], strides = [1, 1]} : vector<32x128xf32> to vector<16x64xf32>
    %3 = vector.extract_strided_slice %1 {offsets = [16, 0], sizes = [1, 64], strides = [1, 1]} : vector<32x128xf32> to vector<1x64xf32>
    %4 = vector.extract_strided_slice %1 {offsets = [17, 0], sizes = [1, 64], strides = [1, 1]} : vector<32x128xf32> to vector<1x64xf32>
    %5 = vector.extract_strided_slice %1 {offsets = [18, 0], sizes = [1, 64], strides = [1, 1]} : vector<32x128xf32> to vector<1x64xf32>
    %6 = vector.shape_cast %5 : vector<1x64xf32> to vector<1x64xf32>
    %7 = vector.broadcast %6 : vector<1x64xf32> to vector<2x64xf32>
    %8 = vector.extract_strided_slice %1 {offsets = [19, 0], sizes = [1, 64], strides = [1, 1]} : vector<32x128xf32> to vector<1x64xf32>
    %9 = vector.shape_cast %8 : vector<1x64xf32> to vector<1x64xf32>
    %10 = vector.broadcast %9 : vector<1x64xf32> to vector<2x64xf32>
    %11 = vector.extract_strided_slice %1 {offsets = [20, 0], sizes = [1, 1], strides = [1, 1]} : vector<32x128xf32> to vector<1x1xf32>
    %12 = vector.extract_strided_slice %1 {offsets = [24, 0], sizes = [8, 16], strides = [1, 1]} : vector<32x128xf32> to vector<8x16xf32>
    %13 = vector.broadcast %0 : vector<16x1xf32> to vector<16x64xf32>
    %14 = vector.broadcast %3 : vector<1x64xf32> to vector<16x64xf32>
    %15 = arith.mulf %13, %14 : vector<16x64xf32>
    %16 = vector.broadcast %4 : vector<1x64xf32> to vector<16x64xf32>
    %17 = arith.addf %15, %16 : vector<16x64xf32>
    %18 = vector.extract_strided_slice %17 {offsets = [0, 0], sizes = [2, 64], strides = [1, 1]} : vector<16x64xf32> to vector<2x64xf32>
    %19 = vector.extract_strided_slice %17 {offsets = [2, 0], sizes = [2, 64], strides = [1, 1]} : vector<16x64xf32> to vector<2x64xf32>
    %20 = vector.extract_strided_slice %17 {offsets = [4, 0], sizes = [2, 64], strides = [1, 1]} : vector<16x64xf32> to vector<2x64xf32>
    %21 = vector.extract_strided_slice %17 {offsets = [6, 0], sizes = [2, 64], strides = [1, 1]} : vector<16x64xf32> to vector<2x64xf32>
    %22 = vector.extract_strided_slice %17 {offsets = [8, 0], sizes = [2, 64], strides = [1, 1]} : vector<16x64xf32> to vector<2x64xf32>
    %23 = vector.extract_strided_slice %17 {offsets = [10, 0], sizes = [2, 64], strides = [1, 1]} : vector<16x64xf32> to vector<2x64xf32>
    %24 = vector.extract_strided_slice %17 {offsets = [12, 0], sizes = [2, 64], strides = [1, 1]} : vector<16x64xf32> to vector<2x64xf32>
    %25 = vector.extract_strided_slice %17 {offsets = [14, 0], sizes = [2, 64], strides = [1, 1]} : vector<16x64xf32> to vector<2x64xf32>
    %26 = vector.extract_strided_slice %12 {offsets = [0, 0], sizes = [1, 16], strides = [1, 1]} : vector<8x16xf32> to vector<1x16xf32>
    %27 = vector.shape_cast %26 : vector<1x16xf32> to vector<1x16xf32>
    %28 = vector.broadcast %27 : vector<1x16xf32> to vector<2x16xf32>
    %29 = vector.extract_strided_slice %12 {offsets = [1, 0], sizes = [1, 16], strides = [1, 1]} : vector<8x16xf32> to vector<1x16xf32>
    %30 = vector.shape_cast %29 : vector<1x16xf32> to vector<1x16xf32>
    %31 = vector.broadcast %30 : vector<1x16xf32> to vector<2x16xf32>
    %32 = vector.extract_strided_slice %12 {offsets = [2, 0], sizes = [1, 16], strides = [1, 1]} : vector<8x16xf32> to vector<1x16xf32>
    %33 = vector.shape_cast %32 : vector<1x16xf32> to vector<1x16xf32>
    %34 = vector.broadcast %33 : vector<1x16xf32> to vector<2x16xf32>
    %35 = vector.extract_strided_slice %12 {offsets = [3, 0], sizes = [1, 16], strides = [1, 1]} : vector<8x16xf32> to vector<1x16xf32>
    %36 = vector.shape_cast %35 : vector<1x16xf32> to vector<1x16xf32>
    %37 = vector.broadcast %36 : vector<1x16xf32> to vector<2x16xf32>
    %38 = vector.extract_strided_slice %12 {offsets = [4, 0], sizes = [1, 16], strides = [1, 1]} : vector<8x16xf32> to vector<1x16xf32>
    %39 = vector.shape_cast %38 : vector<1x16xf32> to vector<1x16xf32>
    %40 = vector.broadcast %39 : vector<1x16xf32> to vector<2x16xf32>
    %41 = vector.extract_strided_slice %12 {offsets = [5, 0], sizes = [1, 16], strides = [1, 1]} : vector<8x16xf32> to vector<1x16xf32>
    %42 = vector.shape_cast %41 : vector<1x16xf32> to vector<1x16xf32>
    %43 = vector.broadcast %42 : vector<1x16xf32> to vector<2x16xf32>
    %44 = vector.extract_strided_slice %12 {offsets = [6, 0], sizes = [1, 16], strides = [1, 1]} : vector<8x16xf32> to vector<1x16xf32>
    %45 = vector.shape_cast %44 : vector<1x16xf32> to vector<1x16xf32>
    %46 = vector.broadcast %45 : vector<1x16xf32> to vector<2x16xf32>
    %47 = vector.extract_strided_slice %12 {offsets = [7, 0], sizes = [1, 16], strides = [1, 1]} : vector<8x16xf32> to vector<1x16xf32>
    %48 = vector.shape_cast %47 : vector<1x16xf32> to vector<1x16xf32>
    %49 = vector.broadcast %48 : vector<1x16xf32> to vector<2x16xf32>
    %cst = arith.constant 0.000000e+00 : f32
    %50 = vector.broadcast %cst : f32 to vector<2x16xf32>
    %cst_3 = arith.constant 0.000000e+00 : f32
    %51 = vector.broadcast %cst_3 : f32 to vector<2x16xf32>
    %cst_4 = arith.constant 0.000000e+00 : f32
    %52 = vector.broadcast %cst_4 : f32 to vector<2x16xf32>
    %cst_5 = arith.constant dense<0.000000e+00> : vector<2x64xf32>
    %53 = tpu.matmul %50, %2, %cst_5 {dimension_numbers = #tpu.dot_dimension_numbers<[1], [0], [0], [1], [0, 0, 1, 1], [], []>} : vector<2x16xf32>, vector<16x64xf32>, vector<2x64xf32> -> vector<2x64xf32>
    %54 = arith.addf %18, %53 : vector<2x64xf32>
    %55 = arith.negf %54 : vector<2x64xf32>
    %56 = math.exp %55 : vector<2x64xf32>
    %cst_6 = arith.constant 1.000000e+00 : f32
    %57 = vector.broadcast %cst_6 : f32 to vector<2x64xf32>
    %58 = arith.addf %57, %56 : vector<2x64xf32>
    %59 = arith.divf %57, %58 : vector<2x64xf32>
    %60 = arith.mulf %59, %7 : vector<2x64xf32>
    %61 = arith.addf %60, %10 : vector<2x64xf32>
    %62 = vector.extract_strided_slice %61 {offsets = [0, 0], sizes = [2, 16], strides = [1, 1]} : vector<2x64xf32> to vector<2x16xf32>
    %63 = vector.extract_strided_slice %61 {offsets = [0, 16], sizes = [2, 16], strides = [1, 1]} : vector<2x64xf32> to vector<2x16xf32>
    %64 = vector.extract_strided_slice %61 {offsets = [0, 32], sizes = [2, 16], strides = [1, 1]} : vector<2x64xf32> to vector<2x16xf32>
    %65 = vector.extract_strided_slice %61 {offsets = [0, 48], sizes = [2, 16], strides = [1, 1]} : vector<2x64xf32> to vector<2x16xf32>
    %66 = arith.mulf %63, %51 : vector<2x16xf32>
    %67 = arith.mulf %62, %64 : vector<2x16xf32>
    %68 = arith.addf %66, %67 : vector<2x16xf32>
    %69 = math.tanh %68 : vector<2x16xf32>
    %70 = arith.mulf %65, %69 : vector<2x16xf32>
    %71 = arith.mulf %70, %28 : vector<2x16xf32>
    %72 = arith.addf %52, %71 : vector<2x16xf32>
    %cst_7 = arith.constant dense<0.000000e+00> : vector<2x64xf32>
    %73 = tpu.matmul %70, %2, %cst_7 {dimension_numbers = #tpu.dot_dimension_numbers<[1], [0], [0], [1], [0, 0, 1, 1], [], []>} : vector<2x16xf32>, vector<16x64xf32>, vector<2x64xf32> -> vector<2x64xf32>
    %74 = arith.addf %19, %73 : vector<2x64xf32>
    %75 = arith.negf %74 : vector<2x64xf32>
    %76 = math.exp %75 : vector<2x64xf32>
    %cst_8 = arith.constant 1.000000e+00 : f32
    %77 = vector.broadcast %cst_8 : f32 to vector<2x64xf32>
    %78 = arith.addf %77, %76 : vector<2x64xf32>
    %79 = arith.divf %77, %78 : vector<2x64xf32>
    %80 = arith.mulf %79, %7 : vector<2x64xf32>
    %81 = arith.addf %80, %10 : vector<2x64xf32>
    %82 = vector.extract_strided_slice %81 {offsets = [0, 0], sizes = [2, 16], strides = [1, 1]} : vector<2x64xf32> to vector<2x16xf32>
    %83 = vector.extract_strided_slice %81 {offsets = [0, 16], sizes = [2, 16], strides = [1, 1]} : vector<2x64xf32> to vector<2x16xf32>
    %84 = vector.extract_strided_slice %81 {offsets = [0, 32], sizes = [2, 16], strides = [1, 1]} : vector<2x64xf32> to vector<2x16xf32>
    %85 = vector.extract_strided_slice %81 {offsets = [0, 48], sizes = [2, 16], strides = [1, 1]} : vector<2x64xf32> to vector<2x16xf32>
    %86 = arith.mulf %83, %68 : vector<2x16xf32>
    %87 = arith.mulf %82, %84 : vector<2x16xf32>
    %88 = arith.addf %86, %87 : vector<2x16xf32>
    %89 = math.tanh %88 : vector<2x16xf32>
    %90 = arith.mulf %85, %89 : vector<2x16xf32>
    %91 = arith.mulf %90, %31 : vector<2x16xf32>
    %92 = arith.addf %72, %91 : vector<2x16xf32>
    %cst_9 = arith.constant dense<0.000000e+00> : vector<2x64xf32>
    %93 = tpu.matmul %90, %2, %cst_9 {dimension_numbers = #tpu.dot_dimension_numbers<[1], [0], [0], [1], [0, 0, 1, 1], [], []>} : vector<2x16xf32>, vector<16x64xf32>, vector<2x64xf32> -> vector<2x64xf32>
    %94 = arith.addf %20, %93 : vector<2x64xf32>
    %95 = arith.negf %94 : vector<2x64xf32>
    %96 = math.exp %95 : vector<2x64xf32>
    %cst_10 = arith.constant 1.000000e+00 : f32
    %97 = vector.broadcast %cst_10 : f32 to vector<2x64xf32>
    %98 = arith.addf %97, %96 : vector<2x64xf32>
    %99 = arith.divf %97, %98 : vector<2x64xf32>
    %100 = arith.mulf %99, %7 : vector<2x64xf32>
    %101 = arith.addf %100, %10 : vector<2x64xf32>
    %102 = vector.extract_strided_slice %101 {offsets = [0, 0], sizes = [2, 16], strides = [1, 1]} : vector<2x64xf32> to vector<2x16xf32>
    %103 = vector.extract_strided_slice %101 {offsets = [0, 16], sizes = [2, 16], strides = [1, 1]} : vector<2x64xf32> to vector<2x16xf32>
    %104 = vector.extract_strided_slice %101 {offsets = [0, 32], sizes = [2, 16], strides = [1, 1]} : vector<2x64xf32> to vector<2x16xf32>
    %105 = vector.extract_strided_slice %101 {offsets = [0, 48], sizes = [2, 16], strides = [1, 1]} : vector<2x64xf32> to vector<2x16xf32>
    %106 = arith.mulf %103, %88 : vector<2x16xf32>
    %107 = arith.mulf %102, %104 : vector<2x16xf32>
    %108 = arith.addf %106, %107 : vector<2x16xf32>
    %109 = math.tanh %108 : vector<2x16xf32>
    %110 = arith.mulf %105, %109 : vector<2x16xf32>
    %111 = arith.mulf %110, %34 : vector<2x16xf32>
    %112 = arith.addf %92, %111 : vector<2x16xf32>
    %cst_11 = arith.constant dense<0.000000e+00> : vector<2x64xf32>
    %113 = tpu.matmul %110, %2, %cst_11 {dimension_numbers = #tpu.dot_dimension_numbers<[1], [0], [0], [1], [0, 0, 1, 1], [], []>} : vector<2x16xf32>, vector<16x64xf32>, vector<2x64xf32> -> vector<2x64xf32>
    %114 = arith.addf %21, %113 : vector<2x64xf32>
    %115 = arith.negf %114 : vector<2x64xf32>
    %116 = math.exp %115 : vector<2x64xf32>
    %cst_12 = arith.constant 1.000000e+00 : f32
    %117 = vector.broadcast %cst_12 : f32 to vector<2x64xf32>
    %118 = arith.addf %117, %116 : vector<2x64xf32>
    %119 = arith.divf %117, %118 : vector<2x64xf32>
    %120 = arith.mulf %119, %7 : vector<2x64xf32>
    %121 = arith.addf %120, %10 : vector<2x64xf32>
    %122 = vector.extract_strided_slice %121 {offsets = [0, 0], sizes = [2, 16], strides = [1, 1]} : vector<2x64xf32> to vector<2x16xf32>
    %123 = vector.extract_strided_slice %121 {offsets = [0, 16], sizes = [2, 16], strides = [1, 1]} : vector<2x64xf32> to vector<2x16xf32>
    %124 = vector.extract_strided_slice %121 {offsets = [0, 32], sizes = [2, 16], strides = [1, 1]} : vector<2x64xf32> to vector<2x16xf32>
    %125 = vector.extract_strided_slice %121 {offsets = [0, 48], sizes = [2, 16], strides = [1, 1]} : vector<2x64xf32> to vector<2x16xf32>
    %126 = arith.mulf %123, %108 : vector<2x16xf32>
    %127 = arith.mulf %122, %124 : vector<2x16xf32>
    %128 = arith.addf %126, %127 : vector<2x16xf32>
    %129 = math.tanh %128 : vector<2x16xf32>
    %130 = arith.mulf %125, %129 : vector<2x16xf32>
    %131 = arith.mulf %130, %37 : vector<2x16xf32>
    %132 = arith.addf %112, %131 : vector<2x16xf32>
    %cst_13 = arith.constant dense<0.000000e+00> : vector<2x64xf32>
    %133 = tpu.matmul %130, %2, %cst_13 {dimension_numbers = #tpu.dot_dimension_numbers<[1], [0], [0], [1], [0, 0, 1, 1], [], []>} : vector<2x16xf32>, vector<16x64xf32>, vector<2x64xf32> -> vector<2x64xf32>
    %134 = arith.addf %22, %133 : vector<2x64xf32>
    %135 = arith.negf %134 : vector<2x64xf32>
    %136 = math.exp %135 : vector<2x64xf32>
    %cst_14 = arith.constant 1.000000e+00 : f32
    %137 = vector.broadcast %cst_14 : f32 to vector<2x64xf32>
    %138 = arith.addf %137, %136 : vector<2x64xf32>
    %139 = arith.divf %137, %138 : vector<2x64xf32>
    %140 = arith.mulf %139, %7 : vector<2x64xf32>
    %141 = arith.addf %140, %10 : vector<2x64xf32>
    %142 = vector.extract_strided_slice %141 {offsets = [0, 0], sizes = [2, 16], strides = [1, 1]} : vector<2x64xf32> to vector<2x16xf32>
    %143 = vector.extract_strided_slice %141 {offsets = [0, 16], sizes = [2, 16], strides = [1, 1]} : vector<2x64xf32> to vector<2x16xf32>
    %144 = vector.extract_strided_slice %141 {offsets = [0, 32], sizes = [2, 16], strides = [1, 1]} : vector<2x64xf32> to vector<2x16xf32>
    %145 = vector.extract_strided_slice %141 {offsets = [0, 48], sizes = [2, 16], strides = [1, 1]} : vector<2x64xf32> to vector<2x16xf32>
    %146 = arith.mulf %143, %128 : vector<2x16xf32>
    %147 = arith.mulf %142, %144 : vector<2x16xf32>
    %148 = arith.addf %146, %147 : vector<2x16xf32>
    %149 = math.tanh %148 : vector<2x16xf32>
    %150 = arith.mulf %145, %149 : vector<2x16xf32>
    %151 = arith.mulf %150, %40 : vector<2x16xf32>
    %152 = arith.addf %132, %151 : vector<2x16xf32>
    %cst_15 = arith.constant dense<0.000000e+00> : vector<2x64xf32>
    %153 = tpu.matmul %150, %2, %cst_15 {dimension_numbers = #tpu.dot_dimension_numbers<[1], [0], [0], [1], [0, 0, 1, 1], [], []>} : vector<2x16xf32>, vector<16x64xf32>, vector<2x64xf32> -> vector<2x64xf32>
    %154 = arith.addf %23, %153 : vector<2x64xf32>
    %155 = arith.negf %154 : vector<2x64xf32>
    %156 = math.exp %155 : vector<2x64xf32>
    %cst_16 = arith.constant 1.000000e+00 : f32
    %157 = vector.broadcast %cst_16 : f32 to vector<2x64xf32>
    %158 = arith.addf %157, %156 : vector<2x64xf32>
    %159 = arith.divf %157, %158 : vector<2x64xf32>
    %160 = arith.mulf %159, %7 : vector<2x64xf32>
    %161 = arith.addf %160, %10 : vector<2x64xf32>
    %162 = vector.extract_strided_slice %161 {offsets = [0, 0], sizes = [2, 16], strides = [1, 1]} : vector<2x64xf32> to vector<2x16xf32>
    %163 = vector.extract_strided_slice %161 {offsets = [0, 16], sizes = [2, 16], strides = [1, 1]} : vector<2x64xf32> to vector<2x16xf32>
    %164 = vector.extract_strided_slice %161 {offsets = [0, 32], sizes = [2, 16], strides = [1, 1]} : vector<2x64xf32> to vector<2x16xf32>
    %165 = vector.extract_strided_slice %161 {offsets = [0, 48], sizes = [2, 16], strides = [1, 1]} : vector<2x64xf32> to vector<2x16xf32>
    %166 = arith.mulf %163, %148 : vector<2x16xf32>
    %167 = arith.mulf %162, %164 : vector<2x16xf32>
    %168 = arith.addf %166, %167 : vector<2x16xf32>
    %169 = math.tanh %168 : vector<2x16xf32>
    %170 = arith.mulf %165, %169 : vector<2x16xf32>
    %171 = arith.mulf %170, %43 : vector<2x16xf32>
    %172 = arith.addf %152, %171 : vector<2x16xf32>
    %cst_17 = arith.constant dense<0.000000e+00> : vector<2x64xf32>
    %173 = tpu.matmul %170, %2, %cst_17 {dimension_numbers = #tpu.dot_dimension_numbers<[1], [0], [0], [1], [0, 0, 1, 1], [], []>} : vector<2x16xf32>, vector<16x64xf32>, vector<2x64xf32> -> vector<2x64xf32>
    %174 = arith.addf %24, %173 : vector<2x64xf32>
    %175 = arith.negf %174 : vector<2x64xf32>
    %176 = math.exp %175 : vector<2x64xf32>
    %cst_18 = arith.constant 1.000000e+00 : f32
    %177 = vector.broadcast %cst_18 : f32 to vector<2x64xf32>
    %178 = arith.addf %177, %176 : vector<2x64xf32>
    %179 = arith.divf %177, %178 : vector<2x64xf32>
    %180 = arith.mulf %179, %7 : vector<2x64xf32>
    %181 = arith.addf %180, %10 : vector<2x64xf32>
    %182 = vector.extract_strided_slice %181 {offsets = [0, 0], sizes = [2, 16], strides = [1, 1]} : vector<2x64xf32> to vector<2x16xf32>
    %183 = vector.extract_strided_slice %181 {offsets = [0, 16], sizes = [2, 16], strides = [1, 1]} : vector<2x64xf32> to vector<2x16xf32>
    %184 = vector.extract_strided_slice %181 {offsets = [0, 32], sizes = [2, 16], strides = [1, 1]} : vector<2x64xf32> to vector<2x16xf32>
    %185 = vector.extract_strided_slice %181 {offsets = [0, 48], sizes = [2, 16], strides = [1, 1]} : vector<2x64xf32> to vector<2x16xf32>
    %186 = arith.mulf %183, %168 : vector<2x16xf32>
    %187 = arith.mulf %182, %184 : vector<2x16xf32>
    %188 = arith.addf %186, %187 : vector<2x16xf32>
    %189 = math.tanh %188 : vector<2x16xf32>
    %190 = arith.mulf %185, %189 : vector<2x16xf32>
    %191 = arith.mulf %190, %46 : vector<2x16xf32>
    %192 = arith.addf %172, %191 : vector<2x16xf32>
    %cst_19 = arith.constant dense<0.000000e+00> : vector<2x64xf32>
    %193 = tpu.matmul %190, %2, %cst_19 {dimension_numbers = #tpu.dot_dimension_numbers<[1], [0], [0], [1], [0, 0, 1, 1], [], []>} : vector<2x16xf32>, vector<16x64xf32>, vector<2x64xf32> -> vector<2x64xf32>
    %194 = arith.addf %25, %193 : vector<2x64xf32>
    %195 = arith.negf %194 : vector<2x64xf32>
    %196 = math.exp %195 : vector<2x64xf32>
    %cst_20 = arith.constant 1.000000e+00 : f32
    %197 = vector.broadcast %cst_20 : f32 to vector<2x64xf32>
    %198 = arith.addf %197, %196 : vector<2x64xf32>
    %199 = arith.divf %197, %198 : vector<2x64xf32>
    %200 = arith.mulf %199, %7 : vector<2x64xf32>
    %201 = arith.addf %200, %10 : vector<2x64xf32>
    %202 = vector.extract_strided_slice %201 {offsets = [0, 0], sizes = [2, 16], strides = [1, 1]} : vector<2x64xf32> to vector<2x16xf32>
    %203 = vector.extract_strided_slice %201 {offsets = [0, 16], sizes = [2, 16], strides = [1, 1]} : vector<2x64xf32> to vector<2x16xf32>
    %204 = vector.extract_strided_slice %201 {offsets = [0, 32], sizes = [2, 16], strides = [1, 1]} : vector<2x64xf32> to vector<2x16xf32>
    %205 = vector.extract_strided_slice %201 {offsets = [0, 48], sizes = [2, 16], strides = [1, 1]} : vector<2x64xf32> to vector<2x16xf32>
    %206 = arith.mulf %203, %188 : vector<2x16xf32>
    %207 = arith.mulf %202, %204 : vector<2x16xf32>
    %208 = arith.addf %206, %207 : vector<2x16xf32>
    %209 = math.tanh %208 : vector<2x16xf32>
    %210 = arith.mulf %205, %209 : vector<2x16xf32>
    %211 = arith.mulf %210, %49 : vector<2x16xf32>
    %212 = arith.addf %192, %211 : vector<2x16xf32>
    %cst_21 = arith.constant dense<0.000000e+00> : vector<2xf32>
    %213 = vector.multi_reduction <add>, %212, %cst_21 [1] : vector<2x16xf32> to vector<2xf32>
    %214 = vector.shape_cast %213 : vector<2xf32> to vector<2x1xf32>
    %215 = vector.broadcast %11 : vector<1x1xf32> to vector<2x1xf32>
    %216 = arith.addf %214, %215 : vector<2x1xf32>
    %c0_22 = arith.constant 0 : index
    %c0_23 = arith.constant 0 : index
    %217 = vector.load %arg2[%c0_22, %c0_23] : memref<2x1xf32, #tpu.memory_space<vmem>>, vector<2x1xf32>
    tpu.vector_store %arg2[%c0_22, %c0_23], %216 {strides = array<i32>} : memref<2x1xf32, #tpu.memory_space<vmem>>, vector<2x1xf32>,
    return
  }
}

</mosaic_0001>

<bundles_post_ra>
// kernel: lstm_forward.1
= control target key start
LH: loop header
LB: loop body
LE: loop exit
PB: predicated region body
PF: predicated region fallthrough
CT: control target
= control target key end

     0   :  { %v752_v2 = vmov 0   ;;  %v753_v4 = vmov 0.0   ;;  %s754_s17 = smov 96   ;;  %s755_s18 = smov 16   ;;  %vm43_vm4 = vcmask 130048   ;;  %s917_s1 = inlined_call_operand.vmem [shape: f32[32,128], index: 1, kind: input, shape index: {}]   ;;  %s918_s0 = inlined_call_operand.vmem [shape: f32[16,1], index: 0, kind: input, shape index: {}]   ;;  %s919_s2 = inlined_call_operand.vmem [shape: f32[2,1], index: 2, kind: output, shape index: {}]  }
   0x1   :  { %v14_v0 = vld [vmem:[%s917_s1 + $0x8] sm:$0xff]  ;;  %v13_v1 = vld [vmem:[%s917_s1] sm:$0xff]  ;;  %702 = vset.pattern.permute.xlu0 %v752_v2  ;;  %703 = vset.pattern.permute.xlu2 %v752_v2  ;;  %v786_v5 = vld [vmem:[%s917_s1 + $0x10] sm:$0xff]  ;;  %s756_s19 = smov 32   ;;  %s757_s20 = smov 80  }
   0x2   :  { %v11_v3 = vld [vmem:[%s918_s0] sm:$0xff]  ;;  %61 = vmatpush.msra.mxu0 %v14_v0  ;;  %131 = vmatpush.msra.mxu1 %v14_v0  ;;  %v29_v6 = vperm.slane %v786_v5, 0  ;;  %v32_v8 = vperm.slane %v786_v5, 1  ;;  %v798_v22 = vperm.slane %v786_v5, 2  ;;  %v801_v25 = vperm.slane %v786_v5, 3  ;;  %s758_s24 = smov 48  }
   0x3   :  { %21 = vperm.xlu0 %702, %v11_v3   ;;  %211 = vmatpush.msra.mxu2 %v14_v0 }
   0x4   :  { %62 = vmatpush.msra.mxu0 %v13_v1  ;;  %291 = vmatpush.msra.mxu3 %v14_v0 }
   0x5   :  { %63 = vmatmul.f32.vlgmr.msra.gmra.mxu0 %v753_v4  ;;  %132 = vmatpush.msra.mxu1 %v13_v1 }
   0x6   :  { %212 = vmatpush.msra.mxu2 %v13_v1  ;;  %292 = vmatpush.msra.mxu3 %v13_v1 }
   0x7   :  { %371 = vmatpush.msrb.mxu0 %v14_v0  ;;  %444 = vmatpush.msrb.mxu1 %v14_v0 }
   0x8   :  { %524 = vmatpush.msrb.mxu2 %v14_v0  ;;  %604 = vmatpush.msrb.mxu3 %v14_v0 }
   0x9   :  { %372 = vmatpush.msrb.mxu0 %v13_v1  ;;  %445 = vmatpush.msrb.mxu1 %v13_v1 }
   0xa   :  { %525 = vmatpush.msrb.mxu2 %v13_v1  ;;  %605 = vmatpush.msrb.mxu3 %v13_v1 }
  0x75   :  { %v22_v7 = vpop.permute.xlu0 %21 }
  0x76   :  { %v30_v9 = vmul.f32 %v29_v6, %v22_v7 }
  0x78   :  { %v794_v10 = vadd.f32 %v32_v8, %v30_v9 }
  0x82   :  { %v64_v11 = vpop.f32.mrf.mxu0 }
  0x83   :  { %v67_v12 = vadd.f32 %v64_v11, %v794_v10 }
  0x85   :  { %v680_v13 = vmul.f32 -1.442695, %v67_v12 }
  0x87   :  { %704 = vpow2.f32 %v680_v13 }
  0x8d   :  { %v705_v14 = vpop.eup %704 }
  0x8e   :  { %v71_v15 = vadd.f32 1.0, %v705_v14 }
  0x90   :  { %706 = vrcp.f32 %v71_v15  ;;  %v83_v19 = vand.u32 2147483648, %v71_v15  ;;  %v81_v21 = vand.u32 2147483647, %v71_v15  ;;  %vm77_vm1 = vweird.f32 %v71_v15 }
  0x92   :  { %v84_v24 = vor.u32 1.1754944e-38, %v83_v19  ;;  %vm82_vm3 = vcmp.eq.f32.partialorder %v81_v21, 8.507059e+37 }
  0x96   :  { %v707_v16 = vpop.eup %706 }
  0x97   :  { %v73_v17 = vmul.f32 %v707_v16, %v71_v15  ;;  %vm78_vm0 = vweird.f32 %v707_v16 }
  0x98   :  { %vm79_vm2 = vmor %vm77_vm1, %vm78_vm0 }
  0x99   :  { %v74_v18 = vsub.f32 1.0, %v73_v17 }
  0x9b   :  { %v75_v20 = vmul.f32 %v707_v16, %v74_v18 }
  0x9d   :  { %v76_v23 = vadd.f32 %v707_v16, %v75_v20 }
  0x9f   :  { %v80_v26 = vsel %vm79_vm2, %v707_v16, %v76_v23 }
  0xa0   :  { %v85_v27 = vsel %vm82_vm3, %v84_v24, %v80_v26 }
  0xa1   :  { %v87_v28 = vmul.f32 %v85_v27, %v798_v22 }
  0xa3   :  { %v88_v29 = vadd.f32 %v87_v28, %v801_v25 }
  0xa5   :  { %91 = vrot.lane.b32.xlu0 %v88_v29, %s754_s17  ;;  %v89_v32 = vmul.f32 0.0, %v88_v29 }
 0x117   :  { %v92_v30 = vpop.permute.xlu0 %91 }
 0x118   :  { %v94_v31 = vmul.f32 %v92_v30, %v88_v29 }
 0x11a   :  { %96 = vrot.lane.b32.xlu1 %v94_v31, %s755_s18 }
 0x18c   :  { %v97_v33 = vpop.permute.xlu1 %96 }
 0x18d   :  { %v99_v34 = vadd.f32 %v97_v33, %v89_v32 }
 0x18f   :  { %708 = vtanh.f32 %v99_v34  ;;  %v163_v59 = vrot.slane %v99_v34, 6 }
 0x195   :  { %v709_v35 = vpop.eup %708 }
 0x196   :  { %102 = vrot.lane.b32.xlu1 %v709_v35, %s756_s19 }
 0x208   :  { %v103_v36 = vpop.permute.xlu1 %102 }
 0x209   :  { %v808_v37 = vmul.f32 %v103_v36, %v88_v29 }
 0x20b   :  { %113 = vrot.lane.b32.xlu2 %v808_v37, %s757_s20 }
 0x265   :  { %v114_v38 = vpop.permute.xlu2 %113 }
 0x266   :  { %681 = vmatmul.msk.f32.vlgmr.msra.gmra.mxu1 %vm43_vm4, %v114_v38 }
 0x2e3   :  { %v134_v39 = vpop.f32.mrf.mxu1 }
 0x2e4   :  { %v138_v40 = vrot.slane %v134_v39, 6 }
 0x2e6   :  { %v140_v41 = vadd.f32 %v138_v40, %v794_v10 }
 0x2e8   :  { %v682_v42 = vmul.f32 -1.442695, %v140_v41 }
 0x2ea   :  { %710 = vpow2.f32 %v682_v42 }
 0x2f0   :  { %v711_v43 = vpop.eup %710 }
 0x2f1   :  { %v144_v44 = vadd.f32 1.0, %v711_v43 }
 0x2f3   :  { %712 = vrcp.f32 %v144_v44  ;;  %v156_v48 = vand.u32 2147483648, %v144_v44  ;;  %v154_v50 = vand.u32 2147483647, %v144_v44  ;;  %vm150_vm6 = vweird.f32 %v144_v44 }
 0x2f5   :  { %v157_v52 = vor.u32 1.1754944e-38, %v156_v48  ;;  %vm155_vm8 = vcmp.eq.f32.partialorder %v154_v50, 8.507059e+37 }
 0x2f9   :  { %v713_v45 = vpop.eup %712 }
 0x2fa   :  { %v146_v46 = vmul.f32 %v713_v45, %v144_v44  ;;  %vm151_vm5 = vweird.f32 %v713_v45 }
 0x2fb   :  { %vm152_vm7 = vmor %vm150_vm6, %vm151_vm5 }
 0x2fc   :  { %v147_v47 = vsub.f32 1.0, %v146_v46 }
 0x2fe   :  { %v148_v49 = vmul.f32 %v713_v45, %v147_v47 }
 0x300   :  { %v149_v51 = vadd.f32 %v713_v45, %v148_v49 }
 0x302   :  { %v153_v53 = vsel %vm152_vm7, %v713_v45, %v149_v51 }
 0x303   :  { %v158_v54 = vsel %vm155_vm8, %v157_v52, %v153_v53 }
 0x304   :  { %v160_v55 = vmul.f32 %v158_v54, %v798_v22 }
 0x306   :  { %v161_v56 = vadd.f32 %v160_v55, %v801_v25 }
 0x308   :  { %167 = vrot.lane.b32.xlu2 %v161_v56, %s754_s17  ;;  %v165_v60 = vmul.f32 %v163_v59, %v161_v56 }
 0x362   :  { %v168_v57 = vpop.permute.xlu2 %167 }
 0x363   :  { %v170_v58 = vmul.f32 %v168_v57, %v161_v56 }
 0x365   :  { %172 = vrot.lane.b32.xlu0 %v170_v58, %s755_s18 }
 0x3d7   :  { %v173_v61 = vpop.permute.xlu0 %172 }
 0x3d8   :  { %v175_v62 = vadd.f32 %v173_v61, %v165_v60 }
 0x3da   :  { %714 = vtanh.f32 %v175_v62  ;;  %v243_v30 = vrot.slane %v175_v62, 6 }
 0x3e0   :  { %v715_v63 = vpop.eup %714 }
 0x3e1   :  { %178 = vrot.lane.b32.xlu1 %v715_v63, %s756_s19 }
 0x453   :  { %v179_v0 = vpop.permute.xlu1 %178 }
 0x454   :  { %v819_v1 = vmul.f32 %v179_v0, %v161_v56 }
 0x456   :  { %v192_v2 = vrot.slane %v819_v1, 2 }
 0x458   :  { %193 = vrot.lane.b32.xlu2 %v192_v2, %s757_s20 }
 0x4b2   :  { %v194_v3 = vpop.permute.xlu2 %193 }
 0x4b3   :  { %683 = vmatmul.msk.f32.vlgmr.msra.gmra.mxu2 %vm43_vm4, %v194_v3 }
 0x536   :  { %v214_v4 = vpop.f32.mrf.mxu2 }
 0x537   :  { %v218_v7 = vrot.slane %v214_v4, 4  ;;  %v12_v4 = vld [vmem:[%s918_s0 + $0x8] sm:$0xff] }
 0x539   :  { %v220_v9 = vadd.f32 %v218_v7, %v794_v10 }
 0x53b   :  { %v684_v11 = vmul.f32 -1.442695, %v220_v9 }
 0x53d   :  { %716 = vpow2.f32 %v684_v11 }
 0x543   :  { %v717_v12 = vpop.eup %716 }
 0x544   :  { %v224_v13 = vadd.f32 1.0, %v717_v12 }
 0x546   :  { %718 = vrcp.f32 %v224_v13  ;;  %v236_v17 = vand.u32 2147483648, %v224_v13  ;;  %v234_v19 = vand.u32 2147483647, %v224_v13  ;;  %vm230_vm10 = vweird.f32 %v224_v13 }
 0x548   :  { %v237_v21 = vor.u32 1.1754944e-38, %v236_v17  ;;  %vm235_vm12 = vcmp.eq.f32.partialorder %v234_v19, 8.507059e+37 }
 0x54c   :  { %v719_v14 = vpop.eup %718 }
 0x54d   :  { %v226_v15 = vmul.f32 %v719_v14, %v224_v13  ;;  %vm231_vm9 = vweird.f32 %v719_v14 }
 0x54e   :  { %vm232_vm11 = vmor %vm230_vm10, %vm231_vm9 }
 0x54f   :  { %v227_v16 = vsub.f32 1.0, %v226_v15 }
 0x551   :  { %v228_v18 = vmul.f32 %v719_v14, %v227_v16 }
 0x553   :  { %v229_v20 = vadd.f32 %v719_v14, %v228_v18 }
 0x555   :  { %v233_v23 = vsel %vm232_vm11, %v719_v14, %v229_v20 }
 0x556   :  { %v238_v24 = vsel %vm235_vm12, %v237_v21, %v233_v23 }
 0x557   :  { %v240_v26 = vmul.f32 %v238_v24, %v798_v22 }
 0x559   :  { %v241_v27 = vadd.f32 %v240_v26, %v801_v25 }
 0x55b   :  { %247 = vrot.lane.b32.xlu0 %v241_v27, %s754_s17  ;;  %v245_v31 = vmul.f32 %v243_v30, %v241_v27 }
 0x5cd   :  { %v248_v28 = vpop.permute.xlu0 %247 }
 0x5ce   :  { %v250_v29 = vmul.f32 %v248_v28, %v241_v27 }
 0x5d0   :  { %252 = vrot.lane.b32.xlu1 %v250_v29, %s755_s18 }
 0x642   :  { %v253_v32 = vpop.permute.xlu1 %252 }
 0x643   :  { %v255_v33 = vadd.f32 %v253_v32, %v245_v31 }
 0x645   :  { %720 = vtanh.f32 %v255_v33  ;;  %v323_v59 = vrot.slane %v255_v33, 6 }
 0x64b   :  { %v721_v34 = vpop.eup %720 }
 0x64c   :  { %258 = vrot.lane.b32.xlu2 %v721_v34, %s756_s19 }
 0x6a6   :  { %v259_v35 = vpop.permute.xlu2 %258 }
 0x6a7   :  { %v830_v36 = vmul.f32 %v259_v35, %v241_v27 }
 0x6a9   :  { %v272_v38 = vrot.slane %v830_v36, 4 }
 0x6ab   :  { %273 = vrot.lane.b32.xlu0 %v272_v38, %s757_s20 }
 0x71d   :  { %v274_v39 = vpop.permute.xlu0 %273 }
 0x71e   :  { %685 = vmatmul.msk.f32.vlgmr.msra.gmra.mxu3 %vm43_vm4, %v274_v39 }
 0x7a1   :  { %v294_v40 = vpop.f32.mrf.mxu3 }
 0x7a2   :  { %v298_v41 = vrot.slane %v294_v40, 2 }
 0x7a4   :  { %v300_v42 = vadd.f32 %v298_v41, %v794_v10 }
 0x7a6   :  { %v686_v43 = vmul.f32 -1.442695, %v300_v42 }
 0x7a8   :  { %722 = vpow2.f32 %v686_v43 }
 0x7ae   :  { %v723_v44 = vpop.eup %722 }
 0x7af   :  { %v304_v45 = vadd.f32 1.0, %v723_v44 }
 0x7b1   :  { %724 = vrcp.f32 %v304_v45  ;;  %v316_v49 = vand.u32 2147483648, %v304_v45  ;;  %v314_v51 = vand.u32 2147483647, %v304_v45  ;;  %vm310_vm14 = vweird.f32 %v304_v45 }
 0x7b3   :  { %v317_v53 = vor.u32 1.1754944e-38, %v316_v49  ;;  %vm315_vm0 = vcmp.eq.f32.partialorder %v314_v51, 8.507059e+37 }
 0x7b7   :  { %v725_v46 = vpop.eup %724 }
 0x7b8   :  { %v306_v47 = vmul.f32 %v725_v46, %v304_v45  ;;  %vm311_vm13 = vweird.f32 %v725_v46 }
 0x7b9   :  { %vm312_vm15 = vmor %vm310_vm14, %vm311_vm13 }
 0x7ba   :  { %v307_v48 = vsub.f32 1.0, %v306_v47 }
 0x7bc   :  { %v308_v50 = vmul.f32 %v725_v46, %v307_v48 }
 0x7be   :  { %v309_v52 = vadd.f32 %v725_v46, %v308_v50 }
 0x7c0   :  { %v313_v54 = vsel %vm312_vm15, %v725_v46, %v309_v52 }
 0x7c1   :  { %v318_v55 = vsel %vm315_vm0, %v317_v53, %v313_v54 }
 0x7c2   :  { %v320_v10 = vmul.f32 %v318_v55, %v798_v22 }
 0x7c4   :  { %v321_v56 = vadd.f32 %v320_v10, %v801_v25 }
 0x7c6   :  { %327 = vrot.lane.b32.xlu1 %v321_v56, %s754_s17  ;;  %v325_v60 = vmul.f32 %v323_v59, %v321_v56 }
 0x838   :  { %v328_v57 = vpop.permute.xlu1 %327 }
 0x839   :  { %v330_v58 = vmul.f32 %v328_v57, %v321_v56 }
 0x83b   :  { %332 = vrot.lane.b32.xlu2 %v330_v58, %s755_s18 }
 0x843   :  { %26 = vperm.xlu2 %703, %v12_v4  }
 0x895   :  { %v333_v61 = vpop.permute.xlu2 %332 }
 0x896   :  { %v335_v62 = vadd.f32 %v333_v61, %v325_v60 }
 0x898   :  { %726 = vtanh.f32 %v335_v62  ;;  %v400_v32 = vrot.slane %v335_v62, 6 }
 0x89d   :  { %v27_v9 = vpop.permute.xlu2 %26 }
 0x89e   :  { %v727_v63 = vpop.eup %726  ;;  %v31_v11 = vmul.f32 %v29_v6, %v27_v9 }
 0x89f   :  { %338 = vrot.lane.b32.xlu0 %v727_v63, %s756_s19 }
 0x8a0   :  { %v853_v12 = vadd.f32 %v32_v8, %v31_v11 }
 0x911   :  { %v339_v0 = vpop.permute.xlu0 %338 }
 0x912   :  { %v841_v2 = vmul.f32 %v339_v0, %v321_v56 }
 0x914   :  { %v352_v3 = vrot.slane %v841_v2, 6 }
 0x916   :  { %353 = vrot.lane.b32.xlu1 %v352_v3, %s757_s20 }
 0x988   :  { %v354_v7 = vpop.permute.xlu1 %353 }
 0x989   :  { %687 = vmatmul.msk.f32.vlgmr.msrb.gmra.mxu0 %vm43_vm4, %v354_v7 }
 0xa06   :  { %v374_v13 = vpop.f32.mrf.mxu0 }
 0xa07   :  { %v377_v14 = vadd.f32 %v374_v13, %v853_v12 }
 0xa09   :  { %v688_v15 = vmul.f32 -1.442695, %v377_v14 }
 0xa0b   :  { %728 = vpow2.f32 %v688_v15 }
 0xa11   :  { %v729_v16 = vpop.eup %728 }
 0xa12   :  { %v381_v17 = vadd.f32 1.0, %v729_v16 }
 0xa14   :  { %730 = vrcp.f32 %v381_v17  ;;  %v393_v21 = vand.u32 2147483648, %v381_v17  ;;  %v391_v24 = vand.u32 2147483647, %v381_v17  ;;  %vm387_vm2 = vweird.f32 %v381_v17 }
 0xa16   :  { %v394_v8 = vor.u32 1.1754944e-38, %v393_v21  ;;  %vm392_vm5 = vcmp.eq.f32.partialorder %v391_v24, 8.507059e+37 }
 0xa1a   :  { %v731_v18 = vpop.eup %730 }
 0xa1b   :  { %v383_v19 = vmul.f32 %v731_v18, %v381_v17  ;;  %vm388_vm1 = vweird.f32 %v731_v18 }
 0xa1c   :  { %vm389_vm3 = vmor %vm387_vm2, %vm388_vm1  ;;  %vm668_vm1 = vcmask 123904   ;;  %vm674_vm2 = vcmask 1024  }
 0xa1d   :  { %v384_v20 = vsub.f32 1.0, %v383_v19 }
 0xa1f   :  { %v385_v23 = vmul.f32 %v731_v18, %v384_v20 }
 0xa21   :  { %v386_v6 = vadd.f32 %v731_v18, %v385_v23 }
 0xa23   :  { %v390_v26 = vsel %vm389_vm3, %v731_v18, %v386_v6 }
 0xa24   :  { %v395_v27 = vsel %vm392_vm5, %v394_v8, %v390_v26 }
 0xa25   :  { %v397_v28 = vmul.f32 %v395_v27, %v798_v22 }
 0xa27   :  { %v398_v29 = vadd.f32 %v397_v28, %v801_v25 }
 0xa29   :  { %404 = vrot.lane.b32.xlu0 %v398_v29, %s754_s17  ;;  %v402_v33 = vmul.f32 %v400_v32, %v398_v29 }
 0xa9b   :  { %v405_v30 = vpop.permute.xlu0 %404 }
 0xa9c   :  { %v407_v31 = vmul.f32 %v405_v30, %v398_v29 }
 0xa9e   :  { %409 = vrot.lane.b32.xlu1 %v407_v31, %s755_s18 }
 0xb10   :  { %v410_v34 = vpop.permute.xlu1 %409 }
 0xb11   :  { %v412_v35 = vadd.f32 %v410_v34, %v402_v33 }
 0xb13   :  { %732 = vtanh.f32 %v412_v35  ;;  %v476_v61 = vrot.slane %v412_v35, 6 }
 0xb19   :  { %v733_v38 = vpop.eup %732 }
 0xb1a   :  { %415 = vrot.lane.b32.xlu2 %v733_v38, %s756_s19 }
 0xb74   :  { %v416_v39 = vpop.permute.xlu2 %415 }
 0xb75   :  { %v861_v40 = vmul.f32 %v416_v39, %v398_v29 }
 0xb77   :  { %426 = vrot.lane.b32.xlu0 %v861_v40, %s757_s20 }
 0xbe9   :  { %v427_v41 = vpop.permute.xlu0 %426 }
 0xbea   :  { %689 = vmatmul.msk.f32.vlgmr.msrb.gmra.mxu1 %vm43_vm4, %v427_v41 }
 0xc67   :  { %v447_v42 = vpop.f32.mrf.mxu1 }
 0xc68   :  { %v451_v43 = vrot.slane %v447_v42, 6 }
 0xc6a   :  { %v453_v44 = vadd.f32 %v451_v43, %v853_v12 }
 0xc6c   :  { %v690_v45 = vmul.f32 -1.442695, %v453_v44  ;;  %v16_v44 = vld [vmem:[%s917_s1 + $0x18] sm:$0xff] }
 0xc6e   :  { %734 = vpow2.f32 %v690_v45  ;;  %v36_v45 = vperm.slane %v16_v44, 1 }
 0xc74   :  { %v735_v46 = vpop.eup %734 }
 0xc75   :  { %v457_v47 = vadd.f32 1.0, %v735_v46  ;;  %v38_v46 = vperm.slane %v16_v44, 3 }
 0xc77   :  { %736 = vrcp.f32 %v457_v47  ;;  %v469_v51 = vand.u32 2147483648, %v457_v47  ;;  %v467_v53 = vand.u32 2147483647, %v457_v47  ;;  %vm463_vm7 = vweird.f32 %v457_v47 }
 0xc79   :  { %v470_v55 = vor.u32 1.1754944e-38, %v469_v51  ;;  %vm468_vm9 = vcmp.eq.f32.partialorder %v467_v53, 8.507059e+37 }
 0xc7d   :  { %v737_v48 = vpop.eup %736 }
 0xc7e   :  { %v459_v49 = vmul.f32 %v737_v48, %v457_v47  ;;  %vm464_vm6 = vweird.f32 %v737_v48  ;;  %v41_v47 = vperm.slane %v16_v44, 6 }
 0xc7f   :  { %vm465_vm8 = vmor %vm463_vm7, %vm464_vm6 }
 0xc80   :  { %v460_v50 = vsub.f32 1.0, %v459_v49 }
 0xc82   :  { %v461_v52 = vmul.f32 %v737_v48, %v460_v50 }
 0xc84   :  { %v462_v54 = vadd.f32 %v737_v48, %v461_v52 }
 0xc86   :  { %v466_v10 = vsel %vm465_vm8, %v737_v48, %v462_v54 }
 0xc87   :  { %v471_v56 = vsel %vm468_vm9, %v470_v55, %v466_v10 }
 0xc88   :  { %v473_v57 = vmul.f32 %v471_v56, %v798_v22 }
 0xc8a   :  { %v474_v58 = vadd.f32 %v473_v57, %v801_v25 }
 0xc8c   :  { %480 = vrot.lane.b32.xlu1 %v474_v58, %s754_s17  ;;  %v478_v62 = vmul.f32 %v476_v61, %v474_v58 }
 0xcfe   :  { %v481_v59 = vpop.permute.xlu1 %480 }
 0xcff   :  { %v483_v60 = vmul.f32 %v481_v59, %v474_v58 }
 0xd01   :  { %485 = vrot.lane.b32.xlu2 %v483_v60, %s755_s18 }
 0xd5b   :  { %v486_v63 = vpop.permute.xlu2 %485 }
 0xd5c   :  { %v488_v0 = vadd.f32 %v486_v63, %v478_v62 }
 0xd5e   :  { %738 = vtanh.f32 %v488_v0  ;;  %v556_v33 = vrot.slane %v488_v0, 6 }
 0xd64   :  { %v739_v3 = vpop.eup %738 }
 0xd65   :  { %491 = vrot.lane.b32.xlu0 %v739_v3, %s756_s19  ;;  %v35_v3 = vperm.slane %v16_v44, 0 }
 0xdd7   :  { %v492_v4 = vpop.permute.xlu0 %491 }
 0xdd8   :  { %v872_v7 = vmul.f32 %v492_v4, %v474_v58  ;;  %v39_v4 = vperm.slane %v16_v44, 4 }
 0xdda   :  { %v505_v9 = vrot.slane %v872_v7, 2 }
 0xddc   :  { %506 = vrot.lane.b32.xlu1 %v505_v9, %s757_s20 }
 0xe4e   :  { %v507_v11 = vpop.permute.xlu1 %506 }
 0xe4f   :  { %691 = vmatmul.msk.f32.vlgmr.msrb.gmra.mxu2 %vm43_vm4, %v507_v11 }
 0xed2   :  { %v527_v13 = vpop.f32.mrf.mxu2 }
 0xed3   :  { %v531_v14 = vrot.slane %v527_v13, 4  ;;  %v37_v13 = vperm.slane %v16_v44, 2 }
 0xed5   :  { %v533_v15 = vadd.f32 %v531_v14, %v853_v12  ;;  %v40_v14 = vperm.slane %v16_v44, 5 }
 0xed7   :  { %v692_v16 = vmul.f32 -1.442695, %v533_v15 }
 0xed9   :  { %740 = vpow2.f32 %v692_v16 }
 0xedf   :  { %v741_v17 = vpop.eup %740 }
 0xee0   :  { %v537_v18 = vadd.f32 1.0, %v741_v17 }
 0xee2   :  { %742 = vrcp.f32 %v537_v18  ;;  %v549_v23 = vand.u32 2147483648, %v537_v18  ;;  %v547_v6 = vand.u32 2147483647, %v537_v18  ;;  %vm543_vm11 = vweird.f32 %v537_v18 }
 0xee4   :  { %v550_v26 = vor.u32 1.1754944e-38, %v549_v23  ;;  %vm548_vm13 = vcmp.eq.f32.partialorder %v547_v6, 8.507059e+37 }
 0xee8   :  { %v743_v19 = vpop.eup %742 }
 0xee9   :  { %v539_v20 = vmul.f32 %v743_v19, %v537_v18  ;;  %vm544_vm10 = vweird.f32 %v743_v19 }
 0xeea   :  { %vm545_vm12 = vmor %vm543_vm11, %vm544_vm10 }
 0xeeb   :  { %v540_v21 = vsub.f32 1.0, %v539_v20 }
 0xeed   :  { %v541_v24 = vmul.f32 %v743_v19, %v540_v21 }
 0xeef   :  { %v542_v8 = vadd.f32 %v743_v19, %v541_v24 }
 0xef1   :  { %v546_v27 = vsel %vm545_vm12, %v743_v19, %v542_v8 }
 0xef2   :  { %v551_v28 = vsel %vm548_vm13, %v550_v26, %v546_v27 }
 0xef3   :  { %v553_v29 = vmul.f32 %v551_v28, %v798_v22 }
 0xef5   :  { %v554_v30 = vadd.f32 %v553_v29, %v801_v25 }
 0xef7   :  { %560 = vrot.lane.b32.xlu2 %v554_v30, %s754_s17  ;;  %v558_v34 = vmul.f32 %v556_v33, %v554_v30 }
 0xf51   :  { %v561_v31 = vpop.permute.xlu2 %560 }
 0xf52   :  { %v563_v32 = vmul.f32 %v561_v31, %v554_v30 }
 0xf54   :  { %565 = vrot.lane.b32.xlu0 %v563_v32, %s755_s18 }
 0xfc6   :  { %v566_v35 = vpop.permute.xlu0 %565 }
 0xfc7   :  { %v568_v38 = vadd.f32 %v566_v35, %v558_v34 }
 0xfc9   :  { %744 = vtanh.f32 %v568_v38 }
 0xfcf   :  { %v745_v39 = vpop.eup %744 }
 0xfd0   :  { %571 = vrot.lane.b32.xlu1 %v745_v39, %s756_s19 }
0x1042   :  { %v572_v41 = vpop.permute.xlu1 %571 }
0x1043   :  { %v883_v42 = vmul.f32 %v572_v41, %v554_v30 }
0x1045   :  { %v585_v43 = vrot.slane %v883_v42, 4 }
0x1047   :  { %586 = vrot.lane.b32.xlu2 %v585_v43, %s757_s20 }
0x104f   :  { %183 = vrot.lane.b32.xlu2 %v36_v45, %s758_s24 }
0x1057   :  { %343 = vrot.lane.b32.xlu2 %v38_v46, %s758_s24 }
0x105f   :  { %576 = vrot.lane.b32.xlu2 %v41_v47, %s758_s24 }
0x10a1   :  { %v587_v48 = vpop.permute.xlu2 %586 }
0x10a2   :  { %693 = vmatmul.msk.f32.vlgmr.msrb.gmra.mxu3 %vm43_vm4, %v587_v48 }
0x10a9   :  { %v184_v19 = vpop.permute.xlu2 %183 }
0x10aa   :  { %v186_v23 = vmul.f32 %v184_v19, %v819_v1 }
0x10ac   :  { %v188_v26 = vrot.slane %v186_v23, 2 }
0x10b1   :  { %v344_v8 = vpop.permute.xlu2 %343 }
0x10b2   :  { %v346_v28 = vmul.f32 %v344_v8, %v841_v2 }
0x10b4   :  { %v348_v33 = vrot.slane %v346_v28, 6 }
0x1125   :  { %v607_v49 = vpop.f32.mrf.mxu3 }
0x1126   :  { %v611_v50 = vrot.slane %v607_v49, 2 }
0x1128   :  { %v613_v51 = vadd.f32 %v611_v50, %v853_v12 }
0x112a   :  { %v694_v52 = vmul.f32 -1.442695, %v613_v51 }
0x112c   :  { %746 = vpow2.f32 %v694_v52 }
0x1132   :  { %v747_v53 = vpop.eup %746 }
0x1133   :  { %v617_v54 = vadd.f32 1.0, %v747_v53 }
0x1135   :  { %748 = vrcp.f32 %v617_v54  ;;  %v629_v57 = vand.u32 2147483648, %v617_v54  ;;  %v627_v59 = vand.u32 2147483647, %v617_v54  ;;  %vm623_vm15 = vweird.f32 %v617_v54 }
0x1137   :  { %v630_v61 = vor.u32 1.1754944e-38, %v629_v57  ;;  %vm628_vm4 = vcmp.eq.f32.partialorder %v627_v59, 8.507059e+37 }
0x113b   :  { %v749_v55 = vpop.eup %748 }
0x113c   :  { %v619_v10 = vmul.f32 %v749_v55, %v617_v54  ;;  %vm624_vm14 = vweird.f32 %v749_v55 }
0x113d   :  { %vm625_vm0 = vmor %vm623_vm15, %vm624_vm14 }
0x113e   :  { %v620_v56 = vsub.f32 1.0, %v619_v10 }
0x1140   :  { %v621_v58 = vmul.f32 %v749_v55, %v620_v56 }
0x1142   :  { %v622_v60 = vadd.f32 %v749_v55, %v621_v58 }
0x1144   :  { %v626_v62 = vsel %vm625_vm0, %v749_v55, %v622_v60 }
0x1145   :  { %v631_v63 = vsel %vm628_vm4, %v630_v61, %v626_v62 }
0x1146   :  { %v633_v12 = vmul.f32 %v631_v63, %v798_v22  ;;  %v42_v22 = vperm.slane %v16_v44, 7 }
0x1148   :  { %v634_v0 = vadd.f32 %v633_v12, %v801_v25  ;;  %v636_v25 = vrot.slane %v568_v38, 6  ;;  %v577_v38 = vpop.permute.xlu2 %576 }
0x114a   :  { %640 = vrot.lane.b32.xlu0 %v634_v0, %s754_s17  ;;  %v638_v15 = vmul.f32 %v636_v25, %v634_v0 }
0x1152   :  { %107 = vrot.lane.b32.xlu0 %v35_v3, %s758_s24 }
0x115a   :  { %420 = vrot.lane.b32.xlu0 %v39_v4, %s758_s24 }
0x11bc   :  { %v641_v9 = vpop.permute.xlu0 %640 }
0x11bd   :  { %v643_v11 = vmul.f32 %v641_v9, %v634_v0 }
0x11bf   :  { %645 = vrot.lane.b32.xlu1 %v643_v11, %s755_s18 }
0x11c4   :  { %v108_v21 = vpop.permute.xlu0 %107 }
0x11c5   :  { %v110_v6 = vmul.f32 %v108_v21, %v808_v37 }
0x11c7   :  { %263 = vrot.lane.b32.xlu1 %v37_v13, %s758_s24  ;;  %v190_v29 = vadd.f32 %v188_v26, %v110_v6 }
0x11cc   :  { %v421_v32 = vpop.permute.xlu0 %420 }
0x11cd   :  { %v423_v1 = vmul.f32 %v421_v32, %v861_v40  ;;  %v672_v40 = vperm.slane %v786_v5, 4 }
0x11cf   :  { %496 = vrot.lane.b32.xlu1 %v40_v14, %s758_s24 }
0x11d7   :  { %656 = vrot.lane.b32.xlu1 %v42_v22, %s758_s24 }
0x1231   :  { %v646_v16 = vpop.permute.xlu1 %645 }
0x1232   :  { %v648_v17 = vadd.f32 %v646_v16, %v638_v15 }
0x1234   :  { %750 = vtanh.f32 %v648_v17 }
0x1239   :  { %v264_v20 = vpop.permute.xlu1 %263 }
0x123a   :  { %v751_v18 = vpop.eup %750  ;;  %v266_v24 = vmul.f32 %v264_v20, %v830_v36  ;;  %v579_v36 = vmul.f32 %v577_v38, %v883_v42 }
0x123b   :  { %651 = vrot.lane.b32.xlu0 %v751_v18, %s756_s19 }
0x123c   :  { %v268_v27 = vrot.slane %v266_v24, 4  ;;  %v581_v2 = vrot.slane %v579_v36, 4 }
0x123e   :  { %v270_v31 = vadd.f32 %v268_v27, %v190_v29 }
0x1240   :  { %v350_v35 = vadd.f32 %v348_v33, %v270_v31 }
0x1241   :  { %v497_v30 = vpop.permute.xlu1 %496 }
0x1242   :  { %v499_v34 = vmul.f32 %v497_v30, %v872_v7  ;;  %v424_v37 = vadd.f32 %v423_v1, %v350_v35 }
0x1244   :  { %v501_v39 = vrot.slane %v499_v34, 2 }
0x1246   :  { %v503_v44 = vadd.f32 %v501_v39, %v424_v37 }
0x1248   :  { %v583_v47 = vadd.f32 %v581_v2, %v503_v44 }
0x1249   :  { %v657_v43 = vpop.permute.xlu1 %656 }
0x12ad   :  { %v652_v41 = vpop.permute.xlu0 %651 }
0x12ae   :  { %v654_v45 = vmul.f32 %v652_v41, %v634_v0 }
0x12b0   :  { %v659_v46 = vmul.f32 %v657_v43, %v654_v45 }
0x12b2   :  { %v661_v48 = vrot.slane %v659_v46, 6 }
0x12b4   :  { %v663_v49 = vadd.f32 %v661_v48, %v583_v47 }
0x12b6   :  { %665 = vrot.lane.b32.xlu2 %v663_v49, %s757_s20 }
0x1310   :  { %v666_v7 = vpop.permute.xlu2 %665 }
0x1311   :  { %v669_v50 = vsel %vm668_vm1, %v666_v7, 0.0 }
0x1312   :  { %670 = vadd.xlane.f32.xlu0 %v669_v50 }
0x1385   :  { %v671_v42 = vpop.xlane.xlu0 %670 }
0x1386   :  { %v673_v51 = vadd.f32 %v672_v40, %v671_v42 }
0x1388   :  { %675 = vst.msk [vmem:[%s919_s2] sm:$0x3] %vm674_vm2, %v673_v51 }

</bundles_post_ra>
